<compile_context>
chip_gen: v7x
topology: tpu7x:2x2x1
jax: 0.10.0
libtpu: 0.0.40
codegen_flags: <defaults>
</compile_context>

<pallas_src>
import functools
import math

import jax
import jax.numpy as jnp
from jax import lax
from jax.experimental import pallas as pl
from jax.experimental.pallas import tpu as pltpu


def _attention_kernel(x_ref, wq_ref, bq_ref, wk_ref, bk_ref, wv_ref, bv_ref,
                      wo_ref, bo_ref, o_ref, q_s, k_s, v_s, ctx_s,
                      *, num_heads, head_dim, compute_dtype):
    cdt = compute_dtype
    x = x_ref[0]                                   # (S, H), already compute dtype

    # Dense QKV projections on the MXU, f32 accumulation, bias add in f32.
    q_s[...] = (jnp.dot(x, wq_ref[...], preferred_element_type=jnp.float32)
                + bq_ref[...]).astype(cdt)
    k_s[...] = (jnp.dot(x, wk_ref[...], preferred_element_type=jnp.float32)
                + bk_ref[...]).astype(cdt)
    v_s[...] = (jnp.dot(x, wv_ref[...], preferred_element_type=jnp.float32)
                + bv_ref[...]).astype(cdt)

    inv_sqrt_d = 1.0 / math.sqrt(head_dim)

    # Statically-unrolled loop over heads (num_heads is small: 4-12).
    for h in range(num_heads):
        sl = slice(h * head_dim, (h + 1) * head_dim)
        qh = q_s[:, sl]                            # (S, dh)
        kh = k_s[:, sl]                            # (S, dh)
        vh = v_s[:, sl]                            # (S, dh)

        # scores = q_h @ k_h^T / sqrt(d_h)   -> (S, S), f32
        scores = lax.dot_general(qh, kh, (((1,), (1,)), ((), ())),
                                 preferred_element_type=jnp.float32)
        scores = scores * inv_sqrt_d

        # numerically-stable softmax over keys, f32
        m = jnp.max(scores, axis=-1, keepdims=True)
        p = jnp.exp(scores - m)
        probs = p / jnp.sum(p, axis=-1, keepdims=True)
        # attn_dropout: identity in eval/inference mode
        # TODO(synk): training-mode stochastic dropout would need pltpu.prng_*

        ctx_h = jnp.dot(probs.astype(cdt), vh,
                        preferred_element_type=jnp.float32)   # (S, dh)
        ctx_s[:, sl] = ctx_h.astype(cdt)

    # Output projection on the concatenated heads (dense (S,H) x (H,H)).
    out = (jnp.dot(ctx_s[...], wo_ref[...], preferred_element_type=jnp.float32)
           + bo_ref[...])
    # proj_dropout: identity in eval/inference mode
    o_ref[0] = out.astype(o_ref.dtype)


def attention_pallas(x, wq, bq, wk, bk, wv, bv, wo, bo, *, num_heads,
                     compute_dtype=jnp.bfloat16,
                     vmem_limit_bytes=64 * 1024 * 1024):
    """x: (B, S, H); each weight is stored as (in, out); biases are (H,)."""
    B, S, H = x.shape
    assert H % num_heads == 0, "hidden size must be divisible by num_heads"
    head_dim = H // num_heads
    out_dtype = x.dtype

    # Pre-cast matmul operands (halves DMA bytes + resident weight VMEM for bf16).
    xc = x.astype(compute_dtype)
    wqc = wq.astype(compute_dtype)
    wkc = wk.astype(compute_dtype)
    wvc = wv.astype(compute_dtype)
    woc = wo.astype(compute_dtype)
    bq2 = bq.reshape(1, H).astype(jnp.float32)
    bk2 = bk.reshape(1, H).astype(jnp.float32)
    bv2 = bv.reshape(1, H).astype(jnp.float32)
    bo2 = bo.reshape(1, H).astype(jnp.float32)

    kernel = functools.partial(_attention_kernel, num_heads=num_heads,
                               head_dim=head_dim, compute_dtype=compute_dtype)

    tok_spec = pl.BlockSpec((1, S, H), lambda b: (b, 0, 0))      # per-batch tile
    w_spec = pl.BlockSpec((H, H), lambda b: (0, 0))              # resident weights
    b_spec = pl.BlockSpec((1, H), lambda b: (0, 0))              # resident biases

    return pl.pallas_call(
        kernel,
        out_shape=jax.ShapeDtypeStruct((B, S, H), out_dtype),
        grid_spec=pltpu.PrefetchScalarGridSpec(
            num_scalar_prefetch=0,
            grid=(B,),
            in_specs=[tok_spec,
                      w_spec, b_spec,     # query
                      w_spec, b_spec,     # key
                      w_spec, b_spec,     # value
                      w_spec, b_spec],    # out projection
            out_specs=tok_spec,
            scratch_shapes=[
                pltpu.VMEM((S, H), compute_dtype),   # q
                pltpu.VMEM((S, H), compute_dtype),   # k
                pltpu.VMEM((S, H), compute_dtype),   # v
                pltpu.VMEM((S, H), compute_dtype),   # concatenated context
            ],
        ),
        compiler_params=pltpu.CompilerParams(
            dimension_semantics=("parallel",),
            vmem_limit_bytes=vmem_limit_bytes,
        ),
    )(xc, wqc, bq2, wkc, bk2, wvc, bv2, woc, bo2)


def init_attention_params(key, hidden_size, dtype=jnp.float32):
    """Mirrors nn.Linear default init; weights stored transposed (in, out)."""
    keys = jax.random.split(key, 8)

    def linear(kw, kb, fan_in, fan_out):
        bound = 1.0 / math.sqrt(fan_in)
        w = jax.random.uniform(kw, (fan_in, fan_out), dtype=dtype,
                               minval=-bound, maxval=bound)
        b = jax.random.uniform(kb, (fan_out,), dtype=dtype,
                               minval=-bound, maxval=bound)
        return w, b

    wq, bq = linear(keys[0], keys[1], hidden_size, hidden_size)
    wk, bk = linear(keys[2], keys[3], hidden_size, hidden_size)
    wv, bv = linear(keys[4], keys[5], hidden_size, hidden_size)
    wo, bo = linear(keys[6], keys[7], hidden_size, hidden_size)
    return wq, bq, wk, bk, wv, bv, wo, bo


def attention_reference(x, wq, bq, wk, bk, wv, bv, wo, bo, *, num_heads):
    """Pure-JAX f32 reference matching the PyTorch forward (eval mode)."""
    B, S, H = x.shape
    dh = H // num_heads

    def split_heads(t):                       # (B,S,H) -> (B,nh,S,dh)
        return t.reshape(B, S, num_heads, dh).transpose(0, 2, 1, 3)

    q = split_heads(x @ wq + bq)
    k = split_heads(x @ wk + bk)
    v = split_heads(x @ wv + bv)
    scores = jnp.einsum('bhqd,bhkd->bhqk', q, k) / math.sqrt(dh)
    probs = jax.nn.softmax(scores, axis=-1)
    ctx = jnp.einsum('bhqk,bhkd->bhqd', probs, v)
    ctx = ctx.transpose(0, 2, 1, 3).reshape(B, S, H)
    return ctx @ wo + bo


if __name__ == "__main__":
    batch, seq, hidden, num_heads = 2, 8, 32, 4
    att_drop_rate = 0.1  # inactive: eval/inference mode (dropout == identity)

    key = jax.random.PRNGKey(0)
    kx, kp = jax.random.split(key)
    x = jax.random.normal(kx, (batch, seq, hidden), dtype=jnp.float32)
    params = init_attention_params(kp, hidden)

    ref = attention_reference(x, *params, num_heads=num_heads)

    # f32 compute path: strict check against the reference.
    out_f32 = attention_pallas(x, *params, num_heads=num_heads,
                               compute_dtype=jnp.float32)
    out_f32 = jax.block_until_ready(out_f32)
    assert out_f32.shape == (batch, seq, hidden)
    assert jnp.allclose(out_f32, ref, atol=1e-5, rtol=1e-5), "f32 mismatch vs reference"

    # bf16 compute path (production/perf default): looser tolerance.
    out_bf16 = attention_pallas(x, *params, num_heads=num_heads,
                                compute_dtype=jnp.bfloat16)
    out_bf16 = jax.block_until_ready(out_bf16)
    assert out_bf16.shape == (batch, seq, hidden)
    assert jnp.allclose(out_bf16, ref, atol=5e-2, rtol=5e-2), "bf16 mismatch vs reference"

    print("KERNEL_OK")
</pallas_src>

<mosaic_0001>
module attributes {stable_mosaic.version = 11 : i64} {
  func.func @_attention_kernel(%arg0: i32, %arg1: memref<1x8x32xf32, #tpu.memory_space<vmem>>, %arg2: memref<32x32xf32, #tpu.memory_space<vmem>>, %arg3: memref<1x32xf32, #tpu.memory_space<vmem>>, %arg4: memref<32x32xf32, #tpu.memory_space<vmem>>, %arg5: memref<1x32xf32, #tpu.memory_space<vmem>>, %arg6: memref<32x32xf32, #tpu.memory_space<vmem>>, %arg7: memref<1x32xf32, #tpu.memory_space<vmem>>, %arg8: memref<32x32xf32, #tpu.memory_space<vmem>>, %arg9: memref<1x32xf32, #tpu.memory_space<vmem>>, %arg10: memref<1x8x32xf32, #tpu.memory_space<vmem>>, %arg11: memref<8x32xf32, #tpu.memory_space<vmem>>, %arg12: memref<8x32xf32, #tpu.memory_space<vmem>>, %arg13: memref<8x32xf32, #tpu.memory_space<vmem>>, %arg14: memref<8x32xf32, #tpu.memory_space<vmem>>) attributes {dimension_semantics = [#tpu.dimension_semantics<parallel>], iteration_bounds = array<i64: 2>, scalar_prefetch = 0 : i64, scratch_operands = 4 : i64, tpu.core_type = #tpu.core_type<tc>, window_params = [{transform_indices = @transform_0, window_bounds = array<i64: 1, 8, 32>}, {pipeline_mode = #tpu.pipeline_mode<synchronous>, transform_indices = @transform_1, window_bounds = array<i64: 32, 32>}, {pipeline_mode = #tpu.pipeline_mode<synchronous>, transform_indices = @transform_2, window_bounds = array<i64: 1, 32>}, {pipeline_mode = #tpu.pipeline_mode<synchronous>, transform_indices = @transform_3, window_bounds = array<i64: 32, 32>}, {pipeline_mode = #tpu.pipeline_mode<synchronous>, transform_indices = @transform_4, window_bounds = array<i64: 1, 32>}, {pipeline_mode = #tpu.pipeline_mode<synchronous>, transform_indices = @transform_5, window_bounds = array<i64: 32, 32>}, {pipeline_mode = #tpu.pipeline_mode<synchronous>, transform_indices = @transform_6, window_bounds = array<i64: 1, 32>}, {pipeline_mode = #tpu.pipeline_mode<synchronous>, transform_indices = @transform_7, window_bounds = array<i64: 32, 32>}, {pipeline_mode = #tpu.pipeline_mode<synchronous>, transform_indices = @transform_8, window_bounds = array<i64: 1, 32>}, {transform_indices = @transform_9, window_bounds = array<i64: 1, 8, 32>}]} {
    %c0 = arith.constant 0 : index
    %c0_0 = arith.constant 0 : index
    %c0_1 = arith.constant 0 : index
    %0 = vector.load %arg1[%c0, %c0_0, %c0_1] : memref<1x8x32xf32, #tpu.memory_space<vmem>>, vector<1x8x32xf32>
    %1 = vector.shape_cast %0 : vector<1x8x32xf32> to vector<8x32xf32>
    %c0_2 = arith.constant 0 : index
    %c0_3 = arith.constant 0 : index
    %2 = vector.load %arg2[%c0_2, %c0_3] : memref<32x32xf32, #tpu.memory_space<vmem>>, vector<32x32xf32>
    %cst = arith.constant dense<0.000000e+00> : vector<8x32xf32>
    %3 = tpu.matmul %1, %2, %cst {dimension_numbers = #tpu.dot_dimension_numbers<[1], [0], [0], [1], [0, 0, 1, 1], [], []>} : vector<8x32xf32>, vector<32x32xf32>, vector<8x32xf32> -> vector<8x32xf32>
    %c0_4 = arith.constant 0 : index
    %c0_5 = arith.constant 0 : index
    %4 = vector.load %arg3[%c0_4, %c0_5] : memref<1x32xf32, #tpu.memory_space<vmem>>, vector<1x32xf32>
    %5 = vector.broadcast %4 : vector<1x32xf32> to vector<8x32xf32>
    %6 = arith.addf %3, %5 : vector<8x32xf32>
    %c0_6 = arith.constant 0 : index
    %c0_7 = arith.constant 0 : index
    %7 = vector.load %arg11[%c0_6, %c0_7] : memref<8x32xf32, #tpu.memory_space<vmem>>, vector<8x32xf32>
    tpu.vector_store %arg11[%c0_6, %c0_7], %6 {strides = array<i32>} : memref<8x32xf32, #tpu.memory_space<vmem>>, vector<8x32xf32>,
    %c0_8 = arith.constant 0 : index
    %c0_9 = arith.constant 0 : index
    %8 = vector.load %arg4[%c0_8, %c0_9] : memref<32x32xf32, #tpu.memory_space<vmem>>, vector<32x32xf32>
    %cst_10 = arith.constant dense<0.000000e+00> : vector<8x32xf32>
    %9 = tpu.matmul %1, %8, %cst_10 {dimension_numbers = #tpu.dot_dimension_numbers<[1], [0], [0], [1], [0, 0, 1, 1], [], []>} : vector<8x32xf32>, vector<32x32xf32>, vector<8x32xf32> -> vector<8x32xf32>
    %c0_11 = arith.constant 0 : index
    %c0_12 = arith.constant 0 : index
    %10 = vector.load %arg5[%c0_11, %c0_12] : memref<1x32xf32, #tpu.memory_space<vmem>>, vector<1x32xf32>
    %11 = vector.broadcast %10 : vector<1x32xf32> to vector<8x32xf32>
    %12 = arith.addf %9, %11 : vector<8x32xf32>
    %c0_13 = arith.constant 0 : index
    %c0_14 = arith.constant 0 : index
    %13 = vector.load %arg12[%c0_13, %c0_14] : memref<8x32xf32, #tpu.memory_space<vmem>>, vector<8x32xf32>
    tpu.vector_store %arg12[%c0_13, %c0_14], %12 {strides = array<i32>} : memref<8x32xf32, #tpu.memory_space<vmem>>, vector<8x32xf32>,
    %c0_15 = arith.constant 0 : index
    %c0_16 = arith.constant 0 : index
    %14 = vector.load %arg6[%c0_15, %c0_16] : memref<32x32xf32, #tpu.memory_space<vmem>>, vector<32x32xf32>
    %cst_17 = arith.constant dense<0.000000e+00> : vector<8x32xf32>
    %15 = tpu.matmul %1, %14, %cst_17 {dimension_numbers = #tpu.dot_dimension_numbers<[1], [0], [0], [1], [0, 0, 1, 1], [], []>} : vector<8x32xf32>, vector<32x32xf32>, vector<8x32xf32> -> vector<8x32xf32>
    %c0_18 = arith.constant 0 : index
    %c0_19 = arith.constant 0 : index
    %16 = vector.load %arg7[%c0_18, %c0_19] : memref<1x32xf32, #tpu.memory_space<vmem>>, vector<1x32xf32>
    %17 = vector.broadcast %16 : vector<1x32xf32> to vector<8x32xf32>
    %18 = arith.addf %15, %17 : vector<8x32xf32>
    %c0_20 = arith.constant 0 : index
    %c0_21 = arith.constant 0 : index
    %19 = vector.load %arg13[%c0_20, %c0_21] : memref<8x32xf32, #tpu.memory_space<vmem>>, vector<8x32xf32>
    tpu.vector_store %arg13[%c0_20, %c0_21], %18 {strides = array<i32>} : memref<8x32xf32, #tpu.memory_space<vmem>>, vector<8x32xf32>,
    %c0_22 = arith.constant 0 : index
    %c0_23 = arith.constant 0 : index
    %20 = vector.load %arg11[%c0_22, %c0_23] : memref<8x32xf32, #tpu.memory_space<vmem>>, vector<8x8xf32>
    %c0_24 = arith.constant 0 : index
    %c0_25 = arith.constant 0 : index
    %21 = vector.load %arg12[%c0_24, %c0_25] : memref<8x32xf32, #tpu.memory_space<vmem>>, vector<8x8xf32>
    %c0_26 = arith.constant 0 : index
    %c0_27 = arith.constant 0 : index
    %22 = vector.load %arg13[%c0_26, %c0_27] : memref<8x32xf32, #tpu.memory_space<vmem>>, vector<8x8xf32>
    %cst_28 = arith.constant dense<0.000000e+00> : vector<8x8xf32>
    %23 = tpu.matmul %20, %21, %cst_28 {dimension_numbers = #tpu.dot_dimension_numbers<[1], [1], [0], [0], [0, 0, 1, 0], [], []>} : vector<8x8xf32>, vector<8x8xf32>, vector<8x8xf32> -> vector<8x8xf32>
    %cst_29 = arith.constant 0.353553385 : f32
    %24 = vector.broadcast %cst_29 : f32 to vector<8x8xf32>
    %25 = arith.mulf %23, %24 : vector<8x8xf32>
    %cst_30 = arith.constant dense<0xFF800000> : vector<8xf32>
    %26 = vector.multi_reduction <maximumf>, %25, %cst_30 [1] : vector<8x8xf32> to vector<8xf32>
    %27 = vector.shape_cast %26 : vector<8xf32> to vector<8x1xf32>
    %28 = vector.broadcast %27 : vector<8x1xf32> to vector<8x8xf32>
    %29 = arith.subf %25, %28 : vector<8x8xf32>
    %30 = math.exp %29 : vector<8x8xf32>
    %cst_31 = arith.constant dense<0.000000e+00> : vector<8xf32>
    %31 = vector.multi_reduction <add>, %30, %cst_31 [1] : vector<8x8xf32> to vector<8xf32>
    %32 = vector.shape_cast %31 : vector<8xf32> to vector<8x1xf32>
    %33 = vector.broadcast %32 : vector<8x1xf32> to vector<8x8xf32>
    %34 = arith.divf %30, %33 : vector<8x8xf32>
    %cst_32 = arith.constant dense<0.000000e+00> : vector<8x8xf32>
    %35 = tpu.matmul %34, %22, %cst_32 {dimension_numbers = #tpu.dot_dimension_numbers<[1], [0], [0], [1], [0, 0, 1, 1], [], []>} : vector<8x8xf32>, vector<8x8xf32>, vector<8x8xf32> -> vector<8x8xf32>
    %c0_33 = arith.constant 0 : index
    %c0_34 = arith.constant 0 : index
    %36 = vector.load %arg14[%c0_33, %c0_34] : memref<8x32xf32, #tpu.memory_space<vmem>>, vector<8x8xf32>
    tpu.vector_store %arg14[%c0_33, %c0_34], %35 {strides = array<i32>} : memref<8x32xf32, #tpu.memory_space<vmem>>, vector<8x8xf32>,
    %c0_35 = arith.constant 0 : index
    %c8 = arith.constant 8 : index
    %37 = vector.load %arg11[%c0_35, %c8] : memref<8x32xf32, #tpu.memory_space<vmem>>, vector<8x8xf32>
    %c0_36 = arith.constant 0 : index
    %c8_37 = arith.constant 8 : index
    %38 = vector.load %arg12[%c0_36, %c8_37] : memref<8x32xf32, #tpu.memory_space<vmem>>, vector<8x8xf32>
    %c0_38 = arith.constant 0 : index
    %c8_39 = arith.constant 8 : index
    %39 = vector.load %arg13[%c0_38, %c8_39] : memref<8x32xf32, #tpu.memory_space<vmem>>, vector<8x8xf32>
    %cst_40 = arith.constant dense<0.000000e+00> : vector<8x8xf32>
    %40 = tpu.matmul %37, %38, %cst_40 {dimension_numbers = #tpu.dot_dimension_numbers<[1], [1], [0], [0], [0, 0, 1, 0], [], []>} : vector<8x8xf32>, vector<8x8xf32>, vector<8x8xf32> -> vector<8x8xf32>
    %cst_41 = arith.constant 0.353553385 : f32
    %41 = vector.broadcast %cst_41 : f32 to vector<8x8xf32>
    %42 = arith.mulf %40, %41 : vector<8x8xf32>
    %cst_42 = arith.constant dense<0xFF800000> : vector<8xf32>
    %43 = vector.multi_reduction <maximumf>, %42, %cst_42 [1] : vector<8x8xf32> to vector<8xf32>
    %44 = vector.shape_cast %43 : vector<8xf32> to vector<8x1xf32>
    %45 = vector.broadcast %44 : vector<8x1xf32> to vector<8x8xf32>
    %46 = arith.subf %42, %45 : vector<8x8xf32>
    %47 = math.exp %46 : vector<8x8xf32>
    %cst_43 = arith.constant dense<0.000000e+00> : vector<8xf32>
    %48 = vector.multi_reduction <add>, %47, %cst_43 [1] : vector<8x8xf32> to vector<8xf32>
    %49 = vector.shape_cast %48 : vector<8xf32> to vector<8x1xf32>
    %50 = vector.broadcast %49 : vector<8x1xf32> to vector<8x8xf32>
    %51 = arith.divf %47, %50 : vector<8x8xf32>
    %cst_44 = arith.constant dense<0.000000e+00> : vector<8x8xf32>
    %52 = tpu.matmul %51, %39, %cst_44 {dimension_numbers = #tpu.dot_dimension_numbers<[1], [0], [0], [1], [0, 0, 1, 1], [], []>} : vector<8x8xf32>, vector<8x8xf32>, vector<8x8xf32> -> vector<8x8xf32>
    %c0_45 = arith.constant 0 : index
    %c8_46 = arith.constant 8 : index
    %53 = vector.load %arg14[%c0_45, %c8_46] : memref<8x32xf32, #tpu.memory_space<vmem>>, vector<8x8xf32>
    tpu.vector_store %arg14[%c0_45, %c8_46], %52 {strides = array<i32>} : memref<8x32xf32, #tpu.memory_space<vmem>>, vector<8x8xf32>,
    %c0_47 = arith.constant 0 : index
    %c16 = arith.constant 16 : index
    %54 = vector.load %arg11[%c0_47, %c16] : memref<8x32xf32, #tpu.memory_space<vmem>>, vector<8x8xf32>
    %c0_48 = arith.constant 0 : index
    %c16_49 = arith.constant 16 : index
    %55 = vector.load %arg12[%c0_48, %c16_49] : memref<8x32xf32, #tpu.memory_space<vmem>>, vector<8x8xf32>
    %c0_50 = arith.constant 0 : index
    %c16_51 = arith.constant 16 : index
    %56 = vector.load %arg13[%c0_50, %c16_51] : memref<8x32xf32, #tpu.memory_space<vmem>>, vector<8x8xf32>
    %cst_52 = arith.constant dense<0.000000e+00> : vector<8x8xf32>
    %57 = tpu.matmul %54, %55, %cst_52 {dimension_numbers = #tpu.dot_dimension_numbers<[1], [1], [0], [0], [0, 0, 1, 0], [], []>} : vector<8x8xf32>, vector<8x8xf32>, vector<8x8xf32> -> vector<8x8xf32>
    %cst_53 = arith.constant 0.353553385 : f32
    %58 = vector.broadcast %cst_53 : f32 to vector<8x8xf32>
    %59 = arith.mulf %57, %58 : vector<8x8xf32>
    %cst_54 = arith.constant dense<0xFF800000> : vector<8xf32>
    %60 = vector.multi_reduction <maximumf>, %59, %cst_54 [1] : vector<8x8xf32> to vector<8xf32>
    %61 = vector.shape_cast %60 : vector<8xf32> to vector<8x1xf32>
    %62 = vector.broadcast %61 : vector<8x1xf32> to vector<8x8xf32>
    %63 = arith.subf %59, %62 : vector<8x8xf32>
    %64 = math.exp %63 : vector<8x8xf32>
    %cst_55 = arith.constant dense<0.000000e+00> : vector<8xf32>
    %65 = vector.multi_reduction <add>, %64, %cst_55 [1] : vector<8x8xf32> to vector<8xf32>
    %66 = vector.shape_cast %65 : vector<8xf32> to vector<8x1xf32>
    %67 = vector.broadcast %66 : vector<8x1xf32> to vector<8x8xf32>
    %68 = arith.divf %64, %67 : vector<8x8xf32>
    %cst_56 = arith.constant dense<0.000000e+00> : vector<8x8xf32>
    %69 = tpu.matmul %68, %56, %cst_56 {dimension_numbers = #tpu.dot_dimension_numbers<[1], [0], [0], [1], [0, 0, 1, 1], [], []>} : vector<8x8xf32>, vector<8x8xf32>, vector<8x8xf32> -> vector<8x8xf32>
    %c0_57 = arith.constant 0 : index
    %c16_58 = arith.constant 16 : index
    %70 = vector.load %arg14[%c0_57, %c16_58] : memref<8x32xf32, #tpu.memory_space<vmem>>, vector<8x8xf32>
    tpu.vector_store %arg14[%c0_57, %c16_58], %69 {strides = array<i32>} : memref<8x32xf32, #tpu.memory_space<vmem>>, vector<8x8xf32>,
    %c0_59 = arith.constant 0 : index
    %c24 = arith.constant 24 : index
    %71 = vector.load %arg11[%c0_59, %c24] : memref<8x32xf32, #tpu.memory_space<vmem>>, vector<8x8xf32>
    %c0_60 = arith.constant 0 : index
    %c24_61 = arith.constant 24 : index
    %72 = vector.load %arg12[%c0_60, %c24_61] : memref<8x32xf32, #tpu.memory_space<vmem>>, vector<8x8xf32>
    %c0_62 = arith.constant 0 : index
    %c24_63 = arith.constant 24 : index
    %73 = vector.load %arg13[%c0_62, %c24_63] : memref<8x32xf32, #tpu.memory_space<vmem>>, vector<8x8xf32>
    %cst_64 = arith.constant dense<0.000000e+00> : vector<8x8xf32>
    %74 = tpu.matmul %71, %72, %cst_64 {dimension_numbers = #tpu.dot_dimension_numbers<[1], [1], [0], [0], [0, 0, 1, 0], [], []>} : vector<8x8xf32>, vector<8x8xf32>, vector<8x8xf32> -> vector<8x8xf32>
    %cst_65 = arith.constant 0.353553385 : f32
    %75 = vector.broadcast %cst_65 : f32 to vector<8x8xf32>
    %76 = arith.mulf %74, %75 : vector<8x8xf32>
    %cst_66 = arith.constant dense<0xFF800000> : vector<8xf32>
    %77 = vector.multi_reduction <maximumf>, %76, %cst_66 [1] : vector<8x8xf32> to vector<8xf32>
    %78 = vector.shape_cast %77 : vector<8xf32> to vector<8x1xf32>
    %79 = vector.broadcast %78 : vector<8x1xf32> to vector<8x8xf32>
    %80 = arith.subf %76, %79 : vector<8x8xf32>
    %81 = math.exp %80 : vector<8x8xf32>
    %cst_67 = arith.constant dense<0.000000e+00> : vector<8xf32>
    %82 = vector.multi_reduction <add>, %81, %cst_67 [1] : vector<8x8xf32> to vector<8xf32>
    %83 = vector.shape_cast %82 : vector<8xf32> to vector<8x1xf32>
    %84 = vector.broadcast %83 : vector<8x1xf32> to vector<8x8xf32>
    %85 = arith.divf %81, %84 : vector<8x8xf32>
    %cst_68 = arith.constant dense<0.000000e+00> : vector<8x8xf32>
    %86 = tpu.matmul %85, %73, %cst_68 {dimension_numbers = #tpu.dot_dimension_numbers<[1], [0], [0], [1], [0, 0, 1, 1], [], []>} : vector<8x8xf32>, vector<8x8xf32>, vector<8x8xf32> -> vector<8x8xf32>
    %c0_69 = arith.constant 0 : index
    %c24_70 = arith.constant 24 : index
    %87 = vector.load %arg14[%c0_69, %c24_70] : memref<8x32xf32, #tpu.memory_space<vmem>>, vector<8x8xf32>
    tpu.vector_store %arg14[%c0_69, %c24_70], %86 {strides = array<i32>} : memref<8x32xf32, #tpu.memory_space<vmem>>, vector<8x8xf32>,
    %c0_71 = arith.constant 0 : index
    %c0_72 = arith.constant 0 : index
    %88 = vector.load %arg14[%c0_71, %c0_72] : memref<8x32xf32, #tpu.memory_space<vmem>>, vector<8x32xf32>
    %c0_73 = arith.constant 0 : index
    %c0_74 = arith.constant 0 : index
    %89 = vector.load %arg8[%c0_73, %c0_74] : memref<32x32xf32, #tpu.memory_space<vmem>>, vector<32x32xf32>
    %cst_75 = arith.constant dense<0.000000e+00> : vector<8x32xf32>
    %90 = tpu.matmul %88, %89, %cst_75 {dimension_numbers = #tpu.dot_dimension_numbers<[1], [0], [0], [1], [0, 0, 1, 1], [], []>} : vector<8x32xf32>, vector<32x32xf32>, vector<8x32xf32> -> vector<8x32xf32>
    %c0_76 = arith.constant 0 : index
    %c0_77 = arith.constant 0 : index
    %91 = vector.load %arg9[%c0_76, %c0_77] : memref<1x32xf32, #tpu.memory_space<vmem>>, vector<1x32xf32>
    %92 = vector.broadcast %91 : vector<1x32xf32> to vector<8x32xf32>
    %93 = arith.addf %90, %92 : vector<8x32xf32>
    %c0_78 = arith.constant 0 : index
    %c0_79 = arith.constant 0 : index
    %c0_80 = arith.constant 0 : index
    %94 = vector.load %arg10[%c0_78, %c0_79, %c0_80] : memref<1x8x32xf32, #tpu.memory_space<vmem>>, vector<1x8x32xf32>
    %95 = vector.shape_cast %94 : vector<1x8x32xf32> to vector<8x32xf32>
    %96 = vector.shape_cast %93 : vector<8x32xf32> to vector<1x8x32xf32>
    tpu.vector_store %arg10[%c0_78, %c0_79, %c0_80], %96 {strides = array<i32>} : memref<1x8x32xf32, #tpu.memory_space<vmem>>, vector<1x8x32xf32>,
    return
  }
  func.func @transform_0(%arg0: i32) -> (i32, i32, i32) {
    %c0_i32 = arith.constant 0 : i32
    %c0_i32_0 = arith.constant 0 : i32
    %c0_i32_1 = arith.constant 0 : i32
    return %arg0, %c0_i32, %c0_i32_0 : i32, i32, i32
  }
  func.func @transform_1(%arg0: i32) -> (i32, i32) {
    %c0_i32 = arith.constant 0 : i32
    %c0_i32_0 = arith.constant 0 : i32
    %c0_i32_1 = arith.constant 0 : i32
    return %c0_i32, %c0_i32_0 : i32, i32
  }
  func.func @transform_2(%arg0: i32) -> (i32, i32) {
    %c0_i32 = arith.constant 0 : i32
    %c0_i32_0 = arith.constant 0 : i32
    %c0_i32_1 = arith.constant 0 : i32
    return %c0_i32, %c0_i32_0 : i32, i32
  }
  func.func @transform_3(%arg0: i32) -> (i32, i32) {
    %c0_i32 = arith.constant 0 : i32
    %c0_i32_0 = arith.constant 0 : i32
    %c0_i32_1 = arith.constant 0 : i32
    return %c0_i32, %c0_i32_0 : i32, i32
  }
  func.func @transform_4(%arg0: i32) -> (i32, i32) {
    %c0_i32 = arith.constant 0 : i32
    %c0_i32_0 = arith.constant 0 : i32
    %c0_i32_1 = arith.constant 0 : i32
    return %c0_i32, %c0_i32_0 : i32, i32
  }
  func.func @transform_5(%arg0: i32) -> (i32, i32) {
    %c0_i32 = arith.constant 0 : i32
    %c0_i32_0 = arith.constant 0 : i32
    %c0_i32_1 = arith.constant 0 : i32
    return %c0_i32, %c0_i32_0 : i32, i32
  }
  func.func @transform_6(%arg0: i32) -> (i32, i32) {
    %c0_i32 = arith.constant 0 : i32
    %c0_i32_0 = arith.constant 0 : i32
    %c0_i32_1 = arith.constant 0 : i32
    return %c0_i32, %c0_i32_0 : i32, i32
  }
  func.func @transform_7(%arg0: i32) -> (i32, i32) {
    %c0_i32 = arith.constant 0 : i32
    %c0_i32_0 = arith.constant 0 : i32
    %c0_i32_1 = arith.constant 0 : i32
    return %c0_i32, %c0_i32_0 : i32, i32
  }
  func.func @transform_8(%arg0: i32) -> (i32, i32) {
    %c0_i32 = arith.constant 0 : i32
    %c0_i32_0 = arith.constant 0 : i32
    %c0_i32_1 = arith.constant 0 : i32
    return %c0_i32, %c0_i32_0 : i32, i32
  }
  func.func @transform_9(%arg0: i32) -> (i32, i32, i32) {
    %c0_i32 = arith.constant 0 : i32
    %c0_i32_0 = arith.constant 0 : i32
    %c0_i32_1 = arith.constant 0 : i32
    return %arg0, %c0_i32, %c0_i32_0 : i32, i32, i32
  }
}

</mosaic_0001>

<bundles_post_ra>
// kernel: tpu_custom_call.1
= control target key start
LH: loop header
LB: loop body
LE: loop exit
PB: predicated region body
PF: predicated region fallthrough
CT: control target
= control target key end

     0   :  { %s2871_s0 = inlined_call_operand.hbm [shape: f32[2,8,32], index: 0, kind: input, shape index: {}]   ;;  %s2872_s1 = inlined_call_operand.hbm [shape: f32[32,32], index: 1, kind: input, shape index: {}]   ;;  %s2873_s2 = inlined_call_operand.hbm [shape: f32[1,32], index: 2, kind: input, shape index: {}]   ;;  %s2874_s3 = inlined_call_operand.hbm [shape: f32[32,32], index: 3, kind: input, shape index: {}]   ;;  %s2875_s4 = inlined_call_operand.hbm [shape: f32[1,32], index: 4, kind: input, shape index: {}]   ;;  %s2876_s5 = inlined_call_operand.hbm [shape: f32[32,32], index: 5, kind: input, shape index: {}]   ;;  %s2877_s6 = inlined_call_operand.hbm [shape: f32[1,32], index: 6, kind: input, shape index: {}]   ;;  %s2878_s7 = inlined_call_operand.hbm [shape: f32[32,32], index: 7, kind: input, shape index: {}]   ;;  %s2879_s8 = inlined_call_operand.hbm [shape: f32[1,32], index: 8, kind: input, shape index: {}]   ;;  %s2880_s9 = inlined_call_operand.hbm [shape: f32[2,8,32], index: 9, kind: output, shape index: {}]  }
   0x1   :  { %2885 = sst [smem:[#allocation28_spill]] %s2872_s1 }
   0x2   :  { %2886 = sst [smem:[#allocation29_spill]] %s2880_s9 }
   0x3   :  { %14 = vsyncpa [#allocation7], 0 }
   0x4   :  { %16 = vsyncpa [#allocation7 + $0x1], 0 }
   0x5   :  { %17 = vsyncpa [#allocation10], 0 }
   0x6   :  { %18 = vsyncpa [#allocation13], 0 }
   0x7   :  { %19 = vsyncpa [#allocation16], 0 }
   0x8   :  { %20 = vsyncpa [#allocation19], 0 }
   0x9   :  { %21 = vsyncpa [#allocation8], 0 }
   0xa   :  { %23 = vsyncpa [#allocation8 + $0x1], 0  ;;  %s2408_s30 = smov 0   ;;  %s2410_s10 = smov 0  }
   0xb   :  { %s2412_s11 = smov 0   ;;  %s2414_s12 = smov 0  }
   0xc LB: > { %s2337_s13 = smov [#allocation9]   ;;  %s2429_s15 = sadd.s32 4294967295, %s2335_s12   ;;  %s2335_s12 = sphi %s2414_s12, %s2913_s12   ;;  %s2331_s11 = sphi %s2412_s11, %s2912_s11   ;;  %s2327_s10 = sphi %s2410_s10, %s2911_s10   ;;  %s2323_s30 = sphi %s2408_s30, %s2910_s30  }
   0xd   : > { %s266_s14 = sshll.u32 %s2337_s13, 4  ;;  %p1654_p0 = scmp.ge.s32.totalorder %s2335_s12, 1  ;;  %s2434_s14 = int_to_ptr.vmem [resolvable:$true] %s266_s14 }
   0xe   : > { %p2882_p1 = scmp.eq.s32.totalorder %s2429_s15, 0  ;;  %p254_p2 = scmp.lt.s32.totalorder %s2335_s12, 3 }
   0xf   : > { %s2338_s17 = smov [#allocation12]   ;;  %s2339_s20 = smov [#allocation15]  }
  0x10   : > { %p2436_p3 = pnand %p1654_p0, %p254_p2  ;;  %s290_s18 = sshll.u32 %s2338_s17, 4  ;;  %s2449_s18 = int_to_ptr.vmem [resolvable:$true] %s290_s18 }
  0x11   : > { %s314_s21 = sshll.u32 %s2339_s20, 4  ;;  %s2889_s1 = sld [smem:[#allocation28_spill]]  ;;  %s2451_s21 = int_to_ptr.vmem [resolvable:$true] %s314_s21 }
  0x12   : > { %s2887_s16 = scalar_select %p2436_p3, 1, 0 }
  0x13   : > { %p1881_p5 = pneg %p2436_p3 }
  0x15   : > { %p2445_p6 = pnand %p1881_p5, %p2882_p1 }
  0x17   : > { %s1999_s24 = scalar_lea.hbm %s2889_s1, 512  ;;  %p2461_p8 = pneg %p2445_p6 }
  0x18   : > { %p2000_p7 = scmp.ne.s32.totalorder %s2889_s1, %s1999_s24  ;;  %p2006_p11 = scmp.lt.u32.totalorder %s1999_s24, %s2889_s1 }
  0x1a   : > { %p2002_p9 = pnand %p2461_p8, %p2000_p7 }
  0x1c   : > { %p2003_p10 = pneg %p2002_p9 }
  0x1e   : > { %p2008_p12 = pnand %p2006_p11, %p2003_p10 }
  0x20   : > { %2011 = shalt.err (!%p2008_p12)
}
  0x21   : > { %s2012_s13 = scalar_lea.vmem %s2434_s14, 512  ;;  %p2020_p5 = scmp.lt.s32.totalorder %s2434_s14, %s2434_s14 }
  0x22   : > { %p2013_p13 = scmp.ne.s32.totalorder %s2434_s14, %s2012_s13  ;;  %p2021_p4 = scmp.lt.s32.totalorder %s2012_s13, %s2012_s13 }
  0x24   : > { %p2015_p0 = pnand %p2013_p13, %p2461_p8  ;;  %p2022_p7 = por %p2021_p4, %p2020_p5 }
  0x26   : > { %p2016_p2 = pneg %p2015_p0 }
  0x28   : > { %p2023_p9 = pnand %p2022_p7, %p2016_p2 }
  0x2a   : > { %2026 = shalt.err (!%p2023_p9)
}
  0x2b   : > { %s2340_s17 = smov 128   ;;  %s2341_s20 = smov 8  }
  0x2c   : > { %1884 = dma.hbm_to_vmem [thread:$0]  (!%p2445_p6), %s2889_s1, 512, %s2434_s14, [#allocation10], %s2340_s17, %s2340_s17, %s2341_s20  }
  0x2d   : > { %s2027_s26 = scalar_lea.hbm %s2874_s3, 512 }
  0x2e   : > { %p2028_p4 = scmp.ne.s32.totalorder %s2874_s3, %s2027_s26  ;;  %p2034_p12 = scmp.lt.u32.totalorder %s2027_s26, %s2874_s3 }
  0x30   : > { %p2030_p10 = pnand %p2028_p4, %p2461_p8 }
  0x32   : > { %p2031_p11 = pneg %p2030_p10 }
  0x34   : > { %p2036_p13 = pnand %p2034_p12, %p2031_p11 }
  0x36   : > { %2039 = shalt.err (!%p2036_p13)
}
  0x37   : > { %s2040_s14 = scalar_lea.vmem %s2449_s18, 512  ;;  %p2048_p7 = scmp.lt.s32.totalorder %s2449_s18, %s2449_s18 }
  0x38   : > { %p2041_p0 = scmp.ne.s32.totalorder %s2449_s18, %s2040_s14  ;;  %p2049_p9 = scmp.lt.s32.totalorder %s2040_s14, %s2040_s14 }
  0x3a   : > { %p2043_p2 = pnand %p2041_p0, %p2461_p8  ;;  %p2050_p4 = por %p2049_p9, %p2048_p7 }
  0x3c   : > { %p2044_p5 = pneg %p2043_p2 }
  0x3e   : > { %p2051_p10 = pnand %p2050_p4, %p2044_p5 }
  0x40   : > { %2054 = shalt.err (!%p2051_p10)
}
  0x41   : > { %1890 = dma.hbm_to_vmem [thread:$0]  (!%p2445_p6), %s2874_s3, 512, %s2449_s18, [#allocation13], %s2340_s17, %s2340_s17, %s2341_s20  }
  0x42   : > { %s2055_s25 = scalar_lea.hbm %s2876_s5, 512 }
  0x43   : > { %p2056_p11 = scmp.ne.s32.totalorder %s2876_s5, %s2055_s25  ;;  %p2062_p0 = scmp.lt.u32.totalorder %s2055_s25, %s2876_s5 }
  0x45   : > { %p2058_p12 = pnand %p2056_p11, %p2461_p8 }
  0x47   : > { %p2059_p13 = pneg %p2058_p12 }
  0x49   : > { %p2064_p2 = pnand %p2062_p0, %p2059_p13 }
  0x4b   : > { %2067 = shalt.err (!%p2064_p2)
}
  0x4c   : > { %s2068_s18 = scalar_lea.vmem %s2451_s21, 512  ;;  %p2076_p4 = scmp.lt.s32.totalorder %s2451_s21, %s2451_s21 }
  0x4d   : > { %p2069_p5 = scmp.ne.s32.totalorder %s2451_s21, %s2068_s18  ;;  %p2077_p10 = scmp.lt.s32.totalorder %s2068_s18, %s2068_s18 }
  0x4f   : > { %p2071_p7 = pnand %p2069_p5, %p2461_p8  ;;  %p2078_p11 = por %p2077_p10, %p2076_p4 }
  0x51   : > { %p2072_p9 = pneg %p2071_p7 }
  0x53   : > { %p2079_p12 = pnand %p2078_p11, %p2072_p9 }
  0x55   : > { %2082 = shalt.err (!%p2079_p12)
}
  0x56   : > { %1896 = dma.hbm_to_vmem [thread:$0]  (!%p2445_p6), %s2876_s5, 512, %s2451_s21, [#allocation16], %s2340_s17, %s2340_s17, %s2341_s20  }
  0x57   : > { %s2342_s22 = smov [#allocation18]   ;;  %s2343_s24 = smov [#allocation11]  }
  0x58   : > { %s338_s23 = sshll.u32 %s2342_s22, 4  ;;  %s280_s25 = sshll.u32 %s2343_s24, 4  ;;  %s339_s23 = int_to_ptr.vmem [resolvable:$true] %s338_s23  ;;  %s281_s25 = int_to_ptr.vmem [resolvable:$true] %s280_s25 }
  0x59   : > { %s2083_s29 = scalar_lea.hbm %s2878_s7, 512 }
  0x5a   : > { %p2084_p13 = scmp.ne.s32.totalorder %s2878_s7, %s2083_s29  ;;  %p2090_p5 = scmp.lt.u32.totalorder %s2083_s29, %s2878_s7 }
  0x5c   : > { %p2086_p0 = pnand %p2084_p13, %p2461_p8 }
  0x5e   : > { %p2087_p2 = pneg %p2086_p0 }
  0x60   : > { %p2092_p7 = pnand %p2090_p5, %p2087_p2 }
  0x62   : > { %2095 = shalt.err (!%p2092_p7)
}
  0x63   : > { %s2096_s21 = scalar_lea.vmem %s339_s23, 512  ;;  %p2104_p11 = scmp.lt.s32.totalorder %s339_s23, %s339_s23 }
  0x64   : > { %p2097_p9 = scmp.ne.s32.totalorder %s339_s23, %s2096_s21  ;;  %p2105_p12 = scmp.lt.s32.totalorder %s2096_s21, %s2096_s21 }
  0x66   : > { %p2099_p4 = pnand %p2097_p9, %p2461_p8  ;;  %p2106_p1 = por %p2105_p12, %p2104_p11 }
  0x68   : > { %p2100_p10 = pneg %p2099_p4 }
  0x6a   : > { %p2107_p3 = pnand %p2106_p1, %p2100_p10 }
  0x6c   : > { %2110 = shalt.err (!%p2107_p3)
}
  0x6d   : > { %1902 = dma.hbm_to_vmem [thread:$0]  (!%p2445_p6), %s2878_s7, 512, %s339_s23, [#allocation19], %s2340_s17, %s2340_s17, %s2341_s20  }
  0x6e   : > { %s2111_s26 = scalar_lea.hbm %s2873_s2, 16 }
  0x6f   : > { %p2112_p1 = scmp.ne.s32.totalorder %s2873_s2, %s2111_s26  ;;  %p2118_p0 = scmp.lt.u32.totalorder %s2111_s26, %s2873_s2 }
  0x71   : > { %p2114_p3 = pnand %p2112_p1, %p2461_p8 }
  0x73   : > { %p2115_p13 = pneg %p2114_p3 }
  0x75   : > { %p2120_p2 = pnand %p2118_p0, %p2115_p13 }
  0x77   : > { %2123 = shalt.err (!%p2120_p2)
}
  0x78   : > { %s2124_s14 = scalar_lea.vmem %s281_s25, 16  ;;  %s2131_s17 = scalar_lea.vmem %s281_s25, 32 }
  0x79   : > { %p2125_p5 = scmp.ne.s32.totalorder %s281_s25, %s2124_s14  ;;  %p2132_p4 = scmp.lt.s32.totalorder %s281_s25, %s281_s25 }
  0x7a   : > { %p2133_p10 = scmp.lt.s32.totalorder %s2131_s17, %s2124_s14 }
  0x7b   : > { %p2127_p7 = pnand %p2125_p5, %p2461_p8 }
  0x7c   : > { %p2134_p11 = por %p2133_p10, %p2132_p4 }
  0x7d   : > { %p2128_p9 = pneg %p2127_p7 }
  0x7f   : > { %p2135_p12 = pnand %p2134_p11, %p2128_p9 }
  0x81   : > { %2138 = shalt.err (!%p2135_p12)
}
  0x82   : > { %1887 = dma.hbm_to_vmem [thread:$0]  (!%p2445_p6), %s2873_s2, 16, %s281_s25, [#allocation10]  }
  0x83   : > { %s2344_s21 = smov [#allocation14]   ;;  %s2345_s9 = smov [#allocation17]  }
  0x84   : > { %s304_s1 = sshll.u32 %s2344_s21, 4  ;;  %s328_s22 = sshll.u32 %s2345_s9, 4  ;;  %s305_s1 = int_to_ptr.vmem [resolvable:$true] %s304_s1  ;;  %s329_s22 = int_to_ptr.vmem [resolvable:$true] %s328_s22 }
  0x85   : > { %s2139_s28 = scalar_lea.hbm %s2875_s4, 16 }
  0x86   : > { %p2140_p1 = scmp.ne.s32.totalorder %s2875_s4, %s2139_s28  ;;  %p2146_p0 = scmp.lt.u32.totalorder %s2139_s28, %s2875_s4 }
  0x88   : > { %p2142_p3 = pnand %p2140_p1, %p2461_p8 }
  0x8a   : > { %p2143_p13 = pneg %p2142_p3 }
  0x8c   : > { %p2148_p2 = pnand %p2146_p0, %p2143_p13 }
  0x8e   : > { %2151 = shalt.err (!%p2148_p2)
}
  0x8f   : > { %s2152_s25 = scalar_lea.vmem %s305_s1, 16  ;;  %s2159_s17 = scalar_lea.vmem %s305_s1, 32 }
  0x90   : > { %p2153_p5 = scmp.ne.s32.totalorder %s305_s1, %s2152_s25  ;;  %p2160_p4 = scmp.lt.s32.totalorder %s305_s1, %s305_s1 }
  0x91   : > { %p2161_p10 = scmp.lt.s32.totalorder %s2159_s17, %s2152_s25 }
  0x92   : > { %p2155_p7 = pnand %p2153_p5, %p2461_p8 }
  0x93   : > { %p2162_p11 = por %p2161_p10, %p2160_p4 }
  0x94   : > { %p2156_p9 = pneg %p2155_p7 }
  0x96   : > { %p2163_p12 = pnand %p2162_p11, %p2156_p9 }
  0x98   : > { %2166 = shalt.err (!%p2163_p12)
}
  0x99   : > { %1893 = dma.hbm_to_vmem [thread:$0]  (!%p2445_p6), %s2875_s4, 16, %s305_s1, [#allocation13]  }
  0x9a   : > { %s2167_s24 = scalar_lea.hbm %s2877_s6, 16 }
  0x9b   : > { %p2168_p1 = scmp.ne.s32.totalorder %s2877_s6, %s2167_s24  ;;  %p2174_p0 = scmp.lt.u32.totalorder %s2167_s24, %s2877_s6 }
  0x9d   : > { %p2170_p3 = pnand %p2168_p1, %p2461_p8 }
  0x9f   : > { %p2171_p13 = pneg %p2170_p3 }
  0xa1   : > { %p2176_p2 = pnand %p2174_p0, %p2171_p13 }
  0xa3   : > { %2179 = shalt.err (!%p2176_p2)
}
  0xa4   : > { %s2180_s18 = scalar_lea.vmem %s329_s22, 16  ;;  %s2187_s1 = scalar_lea.vmem %s329_s22, 32 }
  0xa5   : > { %p2181_p5 = scmp.ne.s32.totalorder %s329_s22, %s2180_s18  ;;  %p2188_p4 = scmp.lt.s32.totalorder %s329_s22, %s329_s22 }
  0xa6   : > { %p2189_p10 = scmp.lt.s32.totalorder %s2187_s1, %s2180_s18 }
  0xa7   : > { %p2183_p7 = pnand %p2181_p5, %p2461_p8 }
  0xa8   : > { %p2190_p11 = por %p2189_p10, %p2188_p4 }
  0xa9   : > { %p2184_p9 = pneg %p2183_p7 }
  0xab   : > { %p2191_p12 = pnand %p2190_p11, %p2184_p9 }
  0xad   : > { %2194 = shalt.err (!%p2191_p12)
}
  0xae   : > { %1899 = dma.hbm_to_vmem [thread:$0]  (!%p2445_p6), %s2877_s6, 16, %s329_s22, [#allocation16]  }
  0xaf   : > { %s2346_s17 = smov [#allocation20]   ;;  %s2195_s9 = scalar_lea.hbm %s2879_s8, 16 }
  0xb0   : > { %s352_s20 = sshll.u32 %s2346_s17, 4  ;;  %p2196_p1 = scmp.ne.s32.totalorder %s2879_s8, %s2195_s9  ;;  %s353_s20 = int_to_ptr.vmem [resolvable:$true] %s352_s20 }
  0xb1   : > { %p2202_p0 = scmp.lt.u32.totalorder %s2195_s9, %s2879_s8 }
  0xb2   : > { %p2198_p3 = pnand %p2196_p1, %p2461_p8 }
  0xb4   : > { %p2199_p13 = pneg %p2198_p3 }
  0xb6   : > { %p2204_p2 = pnand %p2202_p0, %p2199_p13 }
  0xb8   : > { %2207 = shalt.err (!%p2204_p2)
}
  0xb9   : > { %s2208_s22 = scalar_lea.vmem %s353_s20, 16  ;;  %s2215_s13 = scalar_lea.vmem %s353_s20, 32 }
  0xba   : > { %p2209_p5 = scmp.ne.s32.totalorder %s353_s20, %s2208_s22  ;;  %p2216_p4 = scmp.lt.s32.totalorder %s353_s20, %s353_s20 }
  0xbb   : > { %p2217_p10 = scmp.lt.s32.totalorder %s2215_s13, %s2208_s22 }
  0xbc   : > { %p2211_p7 = pnand %p2209_p5, %p2461_p8 }
  0xbd   : > { %p2218_p11 = por %p2217_p10, %p2216_p4 }
  0xbe   : > { %p2212_p9 = pneg %p2211_p7 }
  0xc0   : > { %p2219_p12 = pnand %p2218_p11, %p2212_p9 }
  0xc2   : > { %2222 = shalt.err (!%p2219_p12)
}
  0xc3   : > { %1905 = dma.hbm_to_vmem [thread:$0]  (!%p2445_p6), %s2879_s8, 16, %s353_s20, [#allocation19]  }
  0xc4   : > { %s1653_s27 = sadd.s32 4294967294, %s2335_s12   ;;  %s2632_s19 = sadd.s32 1, %s2335_s12  }
  0xc5   : > { %s33_s14 = ssub.s32 %s2335_s12, %s2632_s19  ;;  %s36_s25 = sadd.s32 1, %s2331_s11 }
  0xc6   : > { %p34_p8 = scmp.eq.s32.totalorder %s33_s14, 0  ;;  %p43_p1 = scmp.ne.s32.totalorder %s2331_s11, %s2327_s10 }
  0xc7   : > { %p44_p3 = scmp.eq.s32.totalorder %s2335_s12, 0  ;;  %p49_p13 = scmp.ne.s32.totalorder %s2327_s10, %s2323_s30 }
  0xc8   : > { %s2643_s17 = scalar_select %p34_p8, %s2331_s11, %s36_s25  }
  0xc9   : > { %p2645_p0 = por %p44_p3, %p43_p1  ;;  %p2892_p2 = scmp.eq.s32.totalorder %s2429_s15, 0 }
  0xca   : > { %p241_p5 = scmp.eq.s32.totalorder %s2429_s15, 1  ;;  %p247_p7 = scmp.eq.s32.totalorder %s1653_s27, 1 }
  0xcb   : > { %p2651_p6 = por %p2892_p2, %p49_p13  ;;  %p1922_p9 = scmp.lt.s32.totalorder %s2335_s12, 2 }
  0xcc   : > { %s363_s21 = sand.u32 1, %s2331_s11   ;;  %p2658_p4 = por %p241_p5, %p43_p1 }
  0xcd   : > { %p2662_p10 = por %p247_p7, %p49_p13  ;;  %s1664_s26 = sshll.u32 %s363_s21, 3 }
  0xce   : > { %s2894_s9 = scalar_select %p2658_p4, 1, 0 }
  0xcf   : > { %s2895_s24 = scalar_select %p2662_p10, 1, 0 }
  0xd0   : > { %s1665_s28 = sshll.u32 %s2335_s12, 7  ;;  %s367_s18 = scalar_lea.vmem [#allocation6], %s1664_s26 }
  0xd1   : > { %s2670_s13 = scalar_lea.hbm %s2871_s0, %s1665_s28  ;;  %s374_s1 = sshll.u32 %s367_s18, 4  ;;  %s2672_s1 = int_to_ptr.vmem [resolvable:$true] %s374_s1 }
  0xd2   : > { %p2676_p11 = pnand %p1922_p9, %p2645_p0  ;;  %s364_s14 = scalar_lea.sflag [#allocation7], %s363_s21 }
  0xd3   : > { %s2223_s25 = scalar_lea.hbm %s2670_s13, 128  ;;  %s2228_s29 = scalar_lea.hbm %s2871_s0, 256 }
  0xd4   : > { %p2224_p12 = scmp.ne.s32.totalorder %s2670_s13, %s2223_s25  ;;  %p2225_p8 = pneg %p2676_p11 }
  0xd5   : > { %p2229_p13 = scmp.lt.u32.totalorder %s2670_s13, %s2871_s0  ;;  %p2230_p0 = scmp.lt.u32.totalorder %s2228_s29, %s2223_s25 }
  0xd6   : > { %p2226_p1 = pnand %p2225_p8, %p2224_p12  ;;  %p2232_p5 = scmp.lt.u32.totalorder %s2223_s25, %s2670_s13 }
  0xd7   : > { %p2231_p2 = por %p2230_p0, %p2229_p13 }
  0xd8   : > { %p2227_p3 = pneg %p2226_p1 }
  0xd9   : > { %p2233_p7 = por %p2232_p5, %p2231_p2 }
  0xdb   : > { %p2234_p9 = pnand %p2233_p7, %p2227_p3 }
  0xdd   : > { %2237 = shalt.err (!%p2234_p9)
}
  0xde   : > { %s2238_s21 = scalar_lea.vmem %s2672_s1, 128  ;;  %s2347_s18 = smov [#allocation6]  }
  0xdf   : > { %p2239_p12 = scmp.ne.s32.totalorder %s2672_s1, %s2238_s21  ;;  %s2243_s26 = sshll.u32 %s2347_s18, 4  ;;  %s2244_s26 = int_to_ptr.vmem [resolvable:$false] %s2243_s26 }
  0xe0   : > { %s2245_s28 = scalar_lea.vmem %s2244_s26, 256  ;;  %p2246_p4 = scmp.lt.s32.totalorder %s2672_s1, %s2244_s26 }
  0xe1   : > { %p2241_p1 = pnand %p2239_p12, %p2225_p8  ;;  %p2247_p13 = scmp.lt.s32.totalorder %s2245_s28, %s2238_s21 }
  0xe3   : > { %p2242_p10 = pneg %p2241_p1  ;;  %p2248_p0 = por %p2247_p13, %p2246_p4 }
  0xe5   : > { %p2249_p2 = pnand %p2248_p0, %p2242_p10 }
  0xe7   : > { %2252 = shalt.err (!%p2249_p2)
}
  0xe8   : > { %1909 = dma.hbm_to_vmem [thread:$0]  (!%p2676_p11), %s2670_s13, 128, %s2672_s1, %s364_s14  }
  0xe9   : > { %p2897_p3 = scmp.ne.s32.totalorder %s2887_s16, 0 }
  0xea   : > { %s2708_s25 = sand.u32 (!%p2897_p3), 1, %s2327_s10  }
  0xeb   : > { %383 = sbr.rel (%p2897_p3) target bundleno = 2178 (0x882), region = 56  ;;  %s1667_s29 = sshll.u32 (!%p2897_p3), %s2708_s25, 3 }
  0xec   : > { %s386_s23 = scalar_lea.sflag (!%p2897_p3), [#allocation7], %s2708_s25  ;;  %s2714_s22 = scalar_lea.vmem (!%p2897_p3), [#allocation6], %s1667_s29 }
  0xf2   : > { %2298 = dma.done.wait (%p2651_p6), %s386_s23, 128  }
  0xf3   : > { %2300 = vsyncadd (%p2651_p6), %s386_s23, 4294967168  ;;  %p2898_p4 = scmp.eq.s32.totalorder %s2429_s15, 0 }
  0xf5   : > { %2302 = dma.done.wait (%p2898_p4), [#allocation10], 528   ;;  %p2899_p10 = pmov %p2898_p4 }
  0xf6   : > { %p2900_p11 = pmov %p2898_p4 }
  0xf7   : > { %2304 = vsyncadd (%p2899_p10), [#allocation10], 4294966768 }
  0xf8   : > { %2306 = dma.done.wait (%p2900_p11), [#allocation13], 528   ;;  %p2901_p8 = pmov %p2898_p4 }
  0xf9   : > { %p2902_p5 = pmov %p2898_p4 }
  0xfa   : > { %2308 = vsyncadd (%p2901_p8), [#allocation13], 4294966768 }
  0xfb   : > { %2310 = dma.done.wait (%p2902_p5), [#allocation16], 528   ;;  %p2903_p7 = pmov %p2898_p4 }
  0xfc   : > { %p2904_p6 = pmov %p2898_p4 }
  0xfd   : > { %2312 = vsyncadd (%p2903_p7), [#allocation16], 4294966768 }
  0xfe   : > { %2314 = dma.done.wait (%p2904_p6), [#allocation19], 528   ;;  %p2905_p9 = pmov %p2898_p4 }
  0xff   : > { %v2348_v0 = vmov 0.0|0.0   ;;  %vm2349_vm0 = vmmov 0   ;;  %v2350_v1 = vmov 0.0   ;;  %v543_v2 = vld [vmem:[#allocation12] sm:$0xff]  ;;  %v544_v3 = vld [vmem:[#allocation12 + $0x8] sm:$0xff]  ;;  %v545_v7 = vld [vmem:[#allocation12 + $0x10] sm:$0xff] }
 0x100   : > { %2316 = vsyncadd (%p2905_p9), [#allocation19], 4294966768  ;;  %1827 = vmatprep.subr.bf16.mxu1 %v2348_v0  ;;  %1821 = vmatprep.subr.bf16.mxu0 %v2348_v0  ;;  %v457_v4 = vld [vmem:[#allocation9] sm:$0xff]  ;;  %v1828_v5 = vpack.c.bf16 %v544_v3, %v543_v2  ;;  %v458_v6 = vld [vmem:[#allocation9 + $0x8] sm:$0xff]  ;;  %vm468_vm1 = vcmask 261120   ;;  %vm710_vm2 = vcmask 64512  }
 0x101   : > { %1756 = vmatprep.mubr.msk.f32.mxu1 %vm2349_vm0, %v2350_v1  ;;  %1745 = vmatprep.mubr.msk.f32.mxu0 %vm2349_vm0, %v2350_v1  ;;  %v546_v8 = vld [vmem:[#allocation12 + $0x18] sm:$0xff]  ;;  %v1822_v9 = vpack.c.bf16 %v458_v6, %v457_v4  ;;  %v459_v10 = vld [vmem:[#allocation9 + $0x10] sm:$0xff]  ;;  %v1679_v15 = vld [vmem:[#allocation14] ss:$0 sm:$0xff]  ;;  %s2351_s16 = smov 120   ;;  %s2352_s20 = smov 112  }
 0x102   : > { %v460_v11 = vld [vmem:[#allocation9 + $0x18] sm:$0xff]  ;;  %1829 = vmatpush3.bf16.msra.mxu1 %v1828_v5  ;;  %v1831_v12 = vpack.c.bf16 %v546_v8, %v545_v7  ;;  %v1677_v16 = vld [vmem:[#allocation11] ss:$0 sm:$0xff]  ;;  %s2353_s13 = smov 104   ;;  %v625_v25 = vld [vmem:[#allocation15] sm:$0xff]  ;;  %s2354_s1 = smov 8  }
 0x103   : > { %1823 = vmatpush3.bf16.msra.mxu0 %v1822_v9  ;;  %1830 = vmatprep.subr.bf16.mxu1 %v2348_v0  ;;  %v1825_v13 = vpack.c.bf16 %v460_v11, %v459_v10  ;;  %v456_v14 = vld [vmem:[%s2714_s22] sm:$0xff]  ;;  %v1681_v35 = vld [vmem:[#allocation17] ss:$0 sm:$0xff]  ;;  %s2355_s27 = smov 16   ;;  %s2356_s14 = smov 24   ;;  %vm1049_vm3 = vcmask 130112  }
 0x104   : > { %1824 = vmatprep.subr.bf16.mxu0 %v2348_v0  ;;  %v626_v26 = vld [vmem:[#allocation15 + $0x8] sm:$0xff]  ;;  %v627_v27 = vld [vmem:[#allocation15 + $0x10] sm:$0xff]  ;;  %v628_v29 = vld [vmem:[#allocation15 + $0x18] sm:$0xff]  ;;  %vm1227_vm4 = vcmask 195712   ;;  %vm1405_vm5 = vcmask 261312   ;;  %s1698_s21 = sshll.u32 %s2429_s15, 7 }
 0x105   : > { %v1834_v28 = vpack.c.bf16 %v626_v26, %v625_v25  ;;  %v1837_v30 = vpack.c.bf16 %v628_v29, %v627_v27  ;;  %s455_s18 = scalar_lea.vmem [#allocation21], %s1667_s29  ;;  %s2906_s22 = sld [smem:[#allocation29_spill]] }
 0x106   : > { %1832 = vmatpush3.bf16.msra.mxu1 %v1831_v12  ;;  %s1507_s26 = sshll.u32 %s455_s18, 4  ;;  %p2907_p1 = scmp.ne.s32.totalorder %s2894_s9, 0  ;;  %s2828_s26 = int_to_ptr.vmem [resolvable:$true] %s1507_s26 }
 0x107   : > { %1826 = vmatpush3.bf16.msra.mxu0 %v1825_v13  ;;  %1770 = vmatprep.subr.mxu1 %v2350_v1  ;;  %s2253_s15 = scalar_lea.vmem %s2828_s26, 128  ;;  %s2357_s29 = smov [#allocation21]  }
 0x108   : > { %1833 = vmatprep.subr.bf16.mxu0 %v2348_v0  ;;  %p2254_p12 = scmp.ne.s32.totalorder %s2828_s26, %s2253_s15 }
 0x109   : > { %1757 = vmatmul.mubr.msk.f32.vlgmr.msra.gmra.mrb[0].mxu1 %vm468_vm1, %v456_v14 }
 0x10a   : > { %1746 = vmatmul.mubr.msk.f32.vlgmr.msra.gmra.mrb[0].mxu0 %vm468_vm1, %v456_v14  ;;  %1772 = vmatprep.mubr.msk.f32.mxu1 %vm2349_vm0, %v2350_v1  ;;  %p2255_p13 = pnand %p2254_p12, %p2907_p1 }
 0x10b   : > { %1767 = vmatprep.mubr.msk.f32.mxu0 %vm2349_vm0, %v2350_v1  ;;  %1835 = vmatpush3.bf16.msra.mxu0 %v1834_v28 }
 0x10c   : > { %1836 = vmatprep.subr.bf16.mxu0 %v2348_v0  ;;  %p2256_p0 = pneg %p2255_p13 }
 0x10f   : > { %1838 = vmatpush3.bf16.msra.mxu0 %v1837_v30 }
 0x110   : > { %1790 = vmatprep.subr.mxu0 %v2350_v1 }
 0x112   : > { %1768 = vmatmul.mubr.msk.f32.vlgmr.msra.gmra.mrb[2].mxu0 %vm468_vm1, %v456_v14 }
 0x113   : > { %1792 = vmatprep.mubr.msk.f32.mxu0 %vm2349_vm0, %v2350_v1 }
 0x1dc   : > { %v620_v17 = vpop.f32.mrb[0].mxu1 }
 0x1dd   : > { %v621_v18 = vadd.f32 %v1679_v15, %v620_v17  ;;  %v1758_v19 = vpop.f32.mrb[1].mxu1  ;;  %v538_v20 = vpop.f32.mrb[0].mxu0 }
 0x1de   : > { %v539_v21 = vadd.f32 %v1677_v16, %v538_v20  ;;  %v1747_v22 = vpop.f32.mrb[1].mxu0 }
 0x1df   : > { %624 = vst.msk [vmem:[#allocation3] sm:$0xff] %vm468_vm1, %v621_v18 }
 0x1e0   : > { %542 = vst.msk [vmem:[#allocation2] sm:$0xff] %vm468_vm1, %v539_v21 }
 0x1e5   : > { %v702_v36 = vpop.f32.mrb[2].mxu0 }
 0x1e6   : > { %v874_v23 = vld [vmem:[#allocation3] sm:$0xff]  ;;  %v703_v37 = vadd.f32 %v1681_v35, %v702_v36  ;;  %v1769_v38 = vpop.f32.mrb[3].mxu0 }
 0x1e7   : > { %880 = vrot.lane.b32.xlu1 %v874_v23, %s2351_s16  ;;  %1771 = vmatpush3.xpose.msk.msra.mxu1 %vm710_vm2, %v874_v23  ;;  %v707_v24 = vld [vmem:[#allocation2] sm:$0xff] }
 0x1e8   : > { %1775 = vmatprep.subr.mxu1 %v2350_v1  ;;  %706 = vst.msk [vmem:[#allocation4] sm:$0xff] %vm468_vm1, %v703_v37  ;;  %v1410_v36 = vld [vmem:[#allocation18 + $0x10] sm:$0xff]  ;;  %v1411_v37 = vld [vmem:[#allocation18 + $0x18] sm:$0xff] }
 0x1e9   : > { %v1843_v38 = vpack.c.bf16 %v1411_v37, %v1410_v36 }
 0x1ea   : > { %1773 = vmatmul.mubr.msk.f32.vlgmr.msra.gmra.mrb[2].mxu1 %vm710_vm2, %v707_v24 }
 0x1eb   : > { %877 = vrot.lane.b32.xlu1 %v707_v24, %s2351_s16  ;;  %1777 = vmatprep.mubr.msk.f32.mxu1 %vm2349_vm0, %v2350_v1 }
 0x1ef   : > { %1055 = vrot.lane.b32.xlu1 %v707_v24, %s2352_s20  ;;  %v2773_v44 = vld [vmem:[#allocation4] sm:$0xff] }
 0x1f0   : > { %1776 = vmatpush3.msra.mxu1 %v2773_v44 }
 0x1f1   : > { %1780 = vmatprep.subr.mxu1 %v2350_v1 }
 0x1f3   : > { %1236 = vrot.lane.b32.xlu1 %v874_v23, %s2353_s13 }
 0x1f7   : > { %1233 = vrot.lane.b32.xlu1 %v707_v24, %s2353_s13 }
 0x259   : > { %v881_v45 = vpop.permute.xlu1 %880 }
 0x25d   : > { %v878_v46 = vpop.permute.xlu1 %877 }
 0x261   : > { %v1056_v47 = vpop.permute.xlu1 %1055 }
 0x265   : > { %v1237_v50 = vpop.permute.xlu1 %1236 }
 0x269   : > { %v1234_v52 = vpop.permute.xlu1 %1233 }
 0x2bd   : > { %v783_v31 = vpop.f32.mrb[2].mxu1 }
 0x2be   : > { %v787_v32 = vmul.f32 0.35355338, %v783_v31  ;;  %v1774_v33 = vpop.f32.mrb[3].mxu1 }
 0x2bf   : > { %v1408_v33 = vld [vmem:[#allocation18] sm:$0xff] }
 0x2c0   : > { %v788_v34 = vsel %vm710_vm2, %v787_v32, -inf }
 0x2c1   : > { %789 = vmax.xlane.f32.xlu0 %v788_v34  ;;  %v1409_v34 = vld [vmem:[#allocation18 + $0x8] sm:$0xff] }
 0x2c2   : > { %v1840_v35 = vpack.c.bf16 %v1409_v34, %v1408_v33 }
 0x34e   : > { %v790_v39 = vpop.xlane.xlu0 %789 }
 0x34f   : > { %v791_v40 = vsub.f32 %v787_v32, %v790_v39 }
 0x351   : > { %v792_v41 = vmul.f32 1.442695, %v791_v40 }
 0x353   : > { %1983 = vpow2.f32 %v792_v41 }
 0x35d   : > { %v1984_v42 = vpop.eup %1983 }
 0x35e   : > { %v794_v43 = vsel %vm710_vm2, %v1984_v42, 0.0 }
 0x35f   : > { %795 = vadd.xlane.f32.xlu0 %v794_v43 }
 0x375   : > { %1058 = vrot.lane.b32.xlu0 %v874_v23, %s2352_s20 }
 0x3ec   : > { %v796_v48 = vpop.xlane.xlu0 %795 }
 0x3ed   : > { %1985 = vrcp.f32 %v796_v48 }
 0x3f0   : > { %v1059_v49 = vpop.permute.xlu0 %1058 }
 0x3f1   : > { %1791 = vmatpush3.xpose.msk.msra.mxu0 %vm710_vm2, %v1059_v49 }
 0x3f2   : > { %1800 = vmatprep.subr.mxu0 %v2350_v1 }
 0x3f4   : > { %1793 = vmatmul.mubr.msk.f32.vlgmr.msra.gmra.mrb[4].mxu0 %vm710_vm2, %v1056_v47  ;;  %v1695_v47 = vld [vmem:[#allocation20] ss:$0 sm:$0xff] }
 0x3f5   : > { %1801 = vmatpush3.xpose.msk.msra.mxu0 %vm710_vm2, %v1237_v50  ;;  %1802 = vmatprep.mubr.msk.f32.mxu0 %vm2349_vm0, %v2350_v1 }
 0x3f6   : > { %1839 = vmatprep.subr.bf16.mxu0 %v2348_v0 }
 0x3f7   : > { %v1986_v51 = vpop.eup %1985 }
 0x3f8   : > { %v798_v53 = vmul.f32 %v1986_v51, %v1984_v42  ;;  %1803 = vmatmul.mubr.msk.f32.vlgmr.msra.gmra.mrb[6].mxu0 %vm710_vm2, %v1234_v52 }
 0x3f9   : > { %1818 = vmatprep.mubr.msk.f32.mxu0 %vm2349_vm0, %v2350_v1  ;;  %1841 = vmatpush3.bf16.msra.mxu0 %v1840_v35 }
 0x3fa   : > { %1778 = vmatmul.mubr.msk.f32.vlgmr.msra.gmra.mrb[4].mxu1 %vm710_vm2, %v798_v53  ;;  %1842 = vmatprep.subr.bf16.mxu0 %v2348_v0 }
 0x3fb   : > { %1781 = vmatpush3.xpose.msk.msra.mxu1 %vm710_vm2, %v881_v45  ;;  %1782 = vmatprep.mubr.msk.f32.mxu1 %vm2349_vm0, %v2350_v1 }
 0x3fc   : > { %1785 = vmatprep.subr.mxu1 %v2350_v1 }
 0x3fd   : > { %1844 = vmatpush3.bf16.msra.mxu0 %v1843_v38 }
 0x3fe   : > { %1783 = vmatmul.mubr.msk.f32.vlgmr.msra.gmra.mrb[6].mxu1 %vm710_vm2, %v878_v46 }
 0x3ff   : > { %1787 = vmatprep.mubr.msk.f32.mxu1 %vm2349_vm0, %v2350_v1 }
 0x4c7   : > { %v1130_v54 = vpop.f32.mrb[4].mxu0 }
 0x4c8   : > { %v1134_v55 = vmul.f32 0.35355338, %v1130_v54  ;;  %v1794_v56 = vpop.f32.mrb[5].mxu0 }
 0x4ca   : > { %v1135_v57 = vsel %vm710_vm2, %v1134_v55, -inf }
 0x4cb   : > { %1136 = vmax.xlane.f32.xlu0 %v1135_v57  ;;  %v1308_v58 = vpop.f32.mrb[6].mxu0 }
 0x4cc   : > { %v1804_v59 = vpop.f32.mrb[7].mxu0  ;;  %v1312_v3 = vmul.f32 0.35355338, %v1308_v58 }
 0x4cd   : > { %v868_v60 = vpop.f32.mrb[4].mxu1 }
 0x4ce   : > { %872 = vst.msk [vmem:[#allocation5] sm:$0xff] %vm710_vm2, %v868_v60  ;;  %v1779_v61 = vpop.f32.mrb[5].mxu1  ;;  %v1313_v5 = vsel %vm710_vm2, %v1312_v3, -inf }
 0x4d1   : > { %v952_v62 = vpop.f32.mrb[6].mxu1 }
 0x4d2   : > { %v956_v63 = vmul.f32 0.35355338, %v952_v62  ;;  %v1784_v2 = vpop.f32.mrb[7].mxu1 }
 0x4d4   : > { %v957_v4 = vsel %vm710_vm2, %v956_v63, -inf }
 0x4d5   : > { %958 = vmax.xlane.f32.xlu1 %v957_v4 }
 0x4d9   : > { %1314 = vmax.xlane.f32.xlu1 %v1313_v5 }
 0x558   : > { %v1137_v6 = vpop.xlane.xlu0 %1136 }
 0x559   : > { %v1138_v7 = vsub.f32 %v1134_v55, %v1137_v6 }
 0x55b   : > { %v1139_v8 = vmul.f32 1.442695, %v1138_v7 }
 0x55d   : > { %1987 = vpow2.f32 %v1139_v8 }
 0x562   : > { %v959_v9 = vpop.xlane.xlu1 %958 }
 0x563   : > { %v960_v17 = vsub.f32 %v956_v63, %v959_v9 }
 0x565   : > { %v961_v18 = vmul.f32 1.442695, %v960_v17 }
 0x566   : > { %v1315_v10 = vpop.xlane.xlu1 %1314 }
 0x567   : > { %v1988_v11 = vpop.eup %1987  ;;  %v1316_v12 = vsub.f32 %v1312_v3, %v1315_v10 }
 0x568   : > { %v1141_v13 = vsel %vm710_vm2, %v1988_v11, 0.0 }
 0x569   : > { %v1317_v14 = vmul.f32 1.442695, %v1316_v12  ;;  %1142 = vadd.xlane.f32.xlu0 %v1141_v13 }
 0x56b   : > { %1989 = vpow2.f32 %v1317_v14 }
 0x56c   : > { %1991 = vpow2.f32 %v961_v18 }
 0x575   : > { %v1990_v15 = vpop.eup %1989 }
 0x576   : > { %v1319_v16 = vsel %vm710_vm2, %v1990_v15, 0.0  ;;  %v1992_v19 = vpop.eup %1991 }
 0x577   : > { %1320 = vadd.xlane.f32.xlu1 %v1319_v16  ;;  %v963_v20 = vsel %vm710_vm2, %v1992_v19, 0.0 }
 0x57f   : > { %969 = vrot.lane.b32.xlu0 %v2773_v44, %s2351_s16  ;;  %s2826_s16 = scalar_lea.hbm %s2906_s22, %s1698_s21 }
 0x588   : > { %1147 = vrot.lane.b32.xlu1 %v2773_v44, %s2352_s20  ;;  %s1494_s20 = scalar_lea.sflag [#allocation8], %s2708_s25 }
 0x5ac   : > { %964 = vadd.xlane.f32.xlu1 %v963_v20 }
 0x5bd   : > { %1325 = vrot.lane.b32.xlu1 %v2773_v44, %s2353_s13  ;;  %s2257_s13 = sshll.u32 %s2357_s29, 4  ;;  %s2258_s13 = int_to_ptr.vmem [resolvable:$false] %s2257_s13 }
 0x5be   : > { %p2260_p2 = scmp.lt.s32.totalorder %s2828_s26, %s2258_s13 }
 0x5f6   : > { %v1143_v21 = vpop.xlane.xlu0 %1142 }
 0x5fa   : > { %v970_v22 = vpop.permute.xlu0 %969 }
 0x5fb   : > { %1786 = vmatpush3.msra.mxu1 %v970_v22 }
 0x5fc   : > { %1795 = vmatprep.subr.mxu1 %v2350_v1 }
 0x604   : > { %v1321_v23 = vpop.xlane.xlu1 %1320 }
 0x608   : > { %v1148_v24 = vpop.permute.xlu1 %1147 }
 0x639   : > { %v965_v25 = vpop.xlane.xlu1 %964 }
 0x63a   : > { %1993 = vrcp.f32 %v965_v25 }
 0x63b   : > { %1995 = vrcp.f32 %v1143_v21 }
 0x63c   : > { %1997 = vrcp.f32 %v1321_v23 }
 0x63d   : > { %v1326_v31 = vpop.permute.xlu1 %1325 }
 0x644   : > { %v1994_v26 = vpop.eup %1993 }
 0x645   : > { %v967_v27 = vmul.f32 %v1994_v26, %v1992_v19  ;;  %v1996_v28 = vpop.eup %1995 }
 0x646   : > { %v1145_v29 = vmul.f32 %v1996_v28, %v1988_v11  ;;  %v1998_v30 = vpop.eup %1997 }
 0x647   : > { %1788 = vmatmul.mubr.msk.f32.vlgmr.msra.gmra.mrb[8].mxu1 %vm710_vm2, %v967_v27  ;;  %v1323_v32 = vmul.f32 %v1998_v30, %v1990_v15 }
 0x648   : > { %1796 = vmatpush3.msra.mxu1 %v1148_v24  ;;  %1797 = vmatprep.mubr.msk.f32.mxu1 %vm2349_vm0, %v2350_v1 }
 0x649   : > { %1805 = vmatprep.subr.mxu1 %v2350_v1 }
 0x64b   : > { %1798 = vmatmul.mubr.msk.f32.vlgmr.msra.gmra.mrb[10].mxu1 %vm710_vm2, %v1145_v29 }
 0x64c   : > { %1806 = vmatpush3.msra.mxu1 %v1326_v31  ;;  %1807 = vmatprep.mubr.msk.f32.mxu1 %vm2349_vm0, %v2350_v1 }
 0x64f   : > { %1808 = vmatmul.mubr.msk.f32.vlgmr.msra.gmra.mrb[12].mxu1 %vm710_vm2, %v1323_v32 }
 0x71a   : > { %v1041_v39 = vpop.f32.mrb[8].mxu1 }
 0x71b   : > { %1046 = vrot.lane.b32.xlu0 %v1041_v39, %s2354_s1  ;;  %v1789_v40 = vpop.f32.mrb[9].mxu1  ;;  %s2259_s1 = scalar_lea.vmem %s2258_s13, 256 }
 0x71c   : > { %p2261_p3 = scmp.lt.s32.totalorder %s2259_s1, %s2253_s15 }
 0x71e   : > { %v1219_v41 = vpop.f32.mrb[10].mxu1  ;;  %p2262_p4 = por %p2261_p3, %p2260_p2 }
 0x71f   : > { %1224 = vrot.lane.b32.xlu1 %v1219_v41, %s2355_s27  ;;  %v1799_v1 = vpop.f32.mrb[11].mxu1 }
 0x720   : > { %p2263_p10 = pnand %p2262_p4, %p2256_p0 }
 0x722   : > { %v1397_v42 = vpop.f32.mrb[12].mxu1 }
 0x723   : > { %1402 = vrot.lane.b32.xlu0 %v1397_v42, %s2356_s14  ;;  %v1809_v43 = vpop.f32.mrb[13].mxu1 }
 0x78d   : > { %v1047_v44 = vpop.permute.xlu0 %1046 }
 0x78e   : > { %1050 = vst.msk [vmem:[#allocation5] sm:$0xff] %vm1049_vm3, %v1047_v44 }
 0x791   : > { %v1225_v0 = vpop.permute.xlu1 %1224 }
 0x792   : > { %1228 = vst.msk [vmem:[#allocation5] sm:$0xff] %vm1227_vm4, %v1225_v0 }
 0x795   : > { %v1403_v45 = vpop.permute.xlu0 %1402 }
 0x796   : > { %1406 = vst.msk [vmem:[#allocation5] sm:$0xff] %vm1405_vm5, %v1403_v45 }
 0x79d   : > { %v1407_v46 = vld [vmem:[#allocation5] sm:$0xff] }
 0x79e   : > { %1819 = vmatmul.mubr.msk.f32.vlgmr.msra.gmra.mrb[8].mxu0 %vm468_vm1, %v1407_v46 }
 0x871   : > { %v1488_v48 = vpop.f32.mrb[8].mxu0 }
 0x872   : > { %v1489_v49 = vadd.f32 %v1695_v47, %v1488_v48  ;;  %v1820_v50 = vpop.f32.mrb[9].mxu0 }
 0x874   : > { %1492 = vst.msk [vmem:[%s455_s18] sm:$0xff] %vm468_vm1, %v1489_v49 }
 0x875   : > { %2266 = shalt.err (!%p2263_p10)
}
 0x876   : > { %s2267_s25 = scalar_lea.hbm %s2826_s16, 128  ;;  %s2271_s21 = scalar_lea.hbm %s2906_s22, 256 }
 0x877   : > { %p2268_p11 = scmp.ne.s32.totalorder %s2826_s16, %s2267_s25  ;;  %p2272_p7 = scmp.lt.u32.totalorder %s2826_s16, %s2906_s22 }
 0x878   : > { %p2273_p6 = scmp.lt.u32.totalorder %s2271_s21, %s2267_s25  ;;  %p2275_p12 = scmp.lt.u32.totalorder %s2267_s25, %s2826_s16 }
 0x879   : > { %p2269_p8 = pnand %p2268_p11, %p2907_p1 }
 0x87a   : > { %p2274_p9 = por %p2273_p6, %p2272_p7 }
 0x87b   : > { %p2270_p5 = pneg %p2269_p8 }
 0x87c   : > { %p2276_p13 = por %p2275_p12, %p2274_p9 }
 0x87e   : > { %p2277_p0 = pnand %p2276_p13, %p2270_p5 }
 0x880   : > { %2280 = shalt.err (!%p2277_p0)
}
 0x881   : > { %1879 = dma.vmem_to_hbm [thread:$0]  (%p2907_p1), %s2828_s26, 128, %s2826_s16, %s1494_s20  }
 0x882 PF: > { %s1519_s23 = sand.u32 1, %s2323_s30   ;;  %p2908_p2 = scmp.ne.s32.totalorder %s2895_s24, 0 }
 0x883   : > { %p2909_p3 = scmp.ge.s32.totalorder %s2335_s12, 2  ;;  %s1520_s15 = scalar_lea.sflag [#allocation8], %s1519_s23 }
 0x885   : > { %p1911_p4 = pnand %p2909_p3, %p2908_p2 }
 0x887   : > { %2318 = dma.done.wait (!%p1911_p4), %s1520_s15, 128  }
 0x888   : > { %2320 = vsyncadd (!%p1911_p4), %s1520_s15, 4294967168  ;;  %p26_p10 = scmp.ge.s32.totalorder %s2632_s19, 4   ;;  %s2910_s30 = smov %s2327_s10 }
 0x889   : > { %s2911_s10 = smov %s2331_s11  ;;  %s2912_s11 = smov %s2643_s17 }
 0x88a   : > { %s2913_s12 = smov %s2632_s19  ;;  %28 = sbr.rel (!%p26_p10) target bundleno = 12 (0xc), region = 133 }
 0x891   :  { %1525 = vsyncpa [#allocation7], 1 }
 0x892   :  { %1527 = vsyncpa [#allocation7 + $0x1], 1 }
 0x893   :  { %1528 = vsyncpa [#allocation10], 1 }
 0x894   :  { %1529 = vsyncpa [#allocation13], 1 }
 0x895   :  { %1530 = vsyncpa [#allocation16], 1 }
 0x896   :  { %1531 = vsyncpa [#allocation19], 1 }
 0x897   :  { %1532 = vsyncpa [#allocation8], 1 }
 0x898   :  { %1534 = vsyncpa [#allocation8 + $0x1], 1 }

</bundles_post_ra>
